<compile_context>
chip_gen: v7x
topology: tpu7x:2x2x1
jax: 0.10.0
libtpu: 0.0.40
codegen_flags: <defaults>
</compile_context>

<pallas_src>
import jax
import jax.numpy as jnp
from jax.experimental import pallas as pl
from jax.experimental.pallas import tpu as pltpu

_LANE = 128                       # vreg lane width
_TARGET_TILE_BYTES = 4 << 20      # ~4 MiB per output tile (x2 double-buffered)
_MIN_ROWS_FOR_TC_SPLIT = 1024     # only split for megacore if each half >= 256 KiB (f32)


def _single_variance_kernel(var_ref, o_ref):
    # var_ref: SMEM scalar holding the 'variance' parameter (f32, shape (1,))
    # o_ref:   VMEM lane-dense output tile [block_rows, 128]
    s = jnp.exp(var_ref[0] * 10.0)                        # scalar exp (EUP), once per tile
    o_ref[...] = jnp.full(o_ref.shape, s, o_ref.dtype)    # pure broadcast fill -> unmasked vst


def single_variance_forward(x, variance):
    """Pallas equivalent of SingleVarianceNetwork.forward.

    Args:
      x: [N, ...] array; only N (= x.shape[0]) and dtype matter, matching
         PyTorch's len(x) / type_as(x).
      variance: scalar parameter (float32).
    Returns:
      [N, 1] array of dtype x.dtype, every entry == exp(10 * variance).
    """
    n = x.shape[0]
    if n == 0:  # guard the zero-size grid edge case
        return jnp.zeros((0, 1), dtype=x.dtype)

    var_arr = jnp.asarray(variance, dtype=jnp.float32).reshape((1,))

    # Lane-dense internal layout: n elements packed as (rows, 128).
    rows = pl.cdiv(n, _LANE)
    dtype_size = jnp.dtype(x.dtype).itemsize

    # Dtype-aware tile sizing: keep the tile a constant ~4 MiB regardless of
    # dtype (8192 rows f32, 16384 bf16, 32768 int8 -> all satisfy sublane
    # packing divisibility).
    block_rows_cap = max(8, _TARGET_TILE_BYTES // (_LANE * dtype_size))

    if rows > block_rows_cap:
        # Large N: multiple multi-MiB tiles; per-step overhead fully amortized.
        block_rows = block_rows_cap
        num_blocks = pl.cdiv(rows, block_rows)
    elif rows >= _MIN_ROWS_FOR_TC_SPLIT and rows % 16 == 0:
        # Fits in one block, but split in two so v7x's 2 TensorCores both
        # issue stores (each half is still >= 256 KiB, so the extra grid step
        # is negligible on 1-TC v5e/v6e).
        block_rows = rows // 2          # multiple of 8 since rows % 16 == 0
        num_blocks = 2
    else:
        block_rows = rows               # full-array block: (8,128) rule waived
        num_blocks = 1

    dense = pl.pallas_call(
        _single_variance_kernel,
        out_shape=jax.ShapeDtypeStruct((rows, _LANE), x.dtype),
        grid=(num_blocks,),
        in_specs=[pl.BlockSpec(memory_space=pltpu.SMEM)],
        out_specs=pl.BlockSpec((block_rows, _LANE), lambda i: (i, 0)),
        compiler_params=pltpu.CompilerParams(
            dimension_semantics=("parallel",)),
        cost_estimate=pl.CostEstimate(
            flops=0,
            transcendentals=num_blocks,
            bytes_accessed=rows * _LANE * dtype_size),
    )(var_arr)

    # Lane-aligned N: pure reshape, no extra copy. Otherwise slice off the
    # padded tail (only path that materializes a second buffer).
    if n == rows * _LANE:
        return dense.reshape(n, 1)
    return dense.reshape(-1)[:n].reshape(n, 1)


if __name__ == "__main__":
    key = jax.random.PRNGKey(0)

    init_val = 0.3  # deterministic parameter init, as in __init__(init_val)
    variance = jnp.float32(init_val)

    # Shapes consistent with the module's usage (3-D query points):
    #   8      -> tiny single full-array block
    #   200    -> pad-then-slice path (rows=2, n % 128 != 0)
    #   4096   -> lane-aligned single block, pure-reshape return
    #   131072 -> lane-aligned, 2-block split path (megacore sharding)
    for n_pts in (8, 200, 4096, 131072):
        x = jax.random.normal(key, (n_pts, 3), dtype=jnp.float32)

        out = single_variance_forward(x, variance)
        out = jax.block_until_ready(out)

        # Reference check (pure JAX, mirrors the PyTorch forward).
        ref = jnp.ones((n_pts, 1), dtype=x.dtype) * jnp.exp(variance * 10.0)
        assert out.shape == (n_pts, 1), out.shape
        assert out.dtype == x.dtype, out.dtype
        assert jnp.allclose(out, ref, rtol=1e-6, atol=1e-6)

    print("KERNEL_OK")
</pallas_src>

<mosaic_0001>
module attributes {stable_mosaic.version = 11 : i64} {
  func.func @_single_variance_kernel(%arg0: i32, %arg1: memref<1xf32, #tpu.memory_space<smem>>, %arg2: memref<1x128xf32, #tpu.memory_space<vmem>>) attributes {dimension_semantics = [#tpu.dimension_semantics<parallel>], iteration_bounds = array<i64: 1>, scalar_prefetch = 0 : i64, scratch_operands = 0 : i64, tpu.core_type = #tpu.core_type<tc>, window_params = [{transform_indices = @transform_0, window_bounds = array<i64: 1>}, {transform_indices = @transform_1, window_bounds = array<i64: 1, 128>}]} {
    %c0 = arith.constant 0 : index
    %0 = memref.load %arg1[%c0] : memref<1xf32, #tpu.memory_space<smem>>
    %cst = arith.constant 1.000000e+01 : f32
    %1 = arith.mulf %0, %cst : f32
    %2 = math.exp %1 : f32
    %3 = vector.broadcast %2 : f32 to vector<1x128xf32>
    %c0_0 = arith.constant 0 : index
    %c0_1 = arith.constant 0 : index
    %4 = vector.load %arg2[%c0_0, %c0_1] : memref<1x128xf32, #tpu.memory_space<vmem>>, vector<1x128xf32>
    tpu.vector_store %arg2[%c0_0, %c0_1], %3 {strides = array<i32>} : memref<1x128xf32, #tpu.memory_space<vmem>>, vector<1x128xf32>,
    return
  }
  func.func @transform_0(%arg0: i32) -> i32 {
    %c0_i32 = arith.constant 0 : i32
    %c0_i32_0 = arith.constant 0 : i32
    return %c0_i32 : i32
  }
  func.func @transform_1(%arg0: i32) -> (i32, i32) {
    %c0_i32 = arith.constant 0 : i32
    %c0_i32_0 = arith.constant 0 : i32
    return %arg0, %c0_i32 : i32, i32
  }
}

</mosaic_0001>

<bundles_post_ra>
// kernel: tpu_custom_call.1
= control target key start
LH: loop header
LB: loop body
LE: loop exit
PB: predicated region body
PF: predicated region fallthrough
CT: control target
= control target key end

     0   :  { %s87_s0 = inlined_call_operand.<no memory space> [shape: f32[1], index: 0, kind: input, shape index: {}]   ;;  %s88_s1 = inlined_call_operand.hbm [shape: f32[1,128], index: 1, kind: output, shape index: {}]  }
   0x1   :  { %s11_s8 = smul.f32 10.0, %s87_s0 }
   0x2   :  { %7 = vsyncpa [#allocation4], 0  ;;  %s61_s9 = smov [#allocation3]  }
   0x3   :  { %v12_v0 = vstv %s11_s8  ;;  %s24_s10 = sshll.u32 %s61_s9, 4  ;;  %s25_s10 = int_to_ptr.vmem [resolvable:$true] %s24_s10 }
   0x4   :  { %v13_v1 = vmul.f32 1.442695, %v12_v0  ;;  %s37_s12 = scalar_lea.vmem %s25_s10, 16  ;;  %s41_s13 = scalar_lea.vmem %s25_s10, 32 }
   0x5   :  { %p38_p0 = scmp.ne.s32.totalorder %s25_s10, %s37_s12  ;;  %p42_p1 = scmp.lt.s32.totalorder %s25_s10, %s25_s10 }
   0x6   :  { %35 = vpow2.f32 %v13_v1  ;;  %p43_p2 = scmp.lt.s32.totalorder %s41_s13, %s37_s12 }
   0x8   :  { %p44_p3 = por %p43_p2, %p42_p1 }
   0xa   :  { %p45_p4 = pnand %p44_p3, %p38_p0 }
  0x10   :  { %v36_v2 = vpop.eup %35 }
  0x11   :  { %32 = vpush %v36_v2 }
  0x42   :  { %s33_s11 = spop %32 }
  0x43   :  { %v16_v3 = vstv %s33_s11 }
  0x44   :  { %17 = vst [vmem:[#allocation3] sm:$0x1] %v16_v3 }
  0x45   :  { %48 = shalt.err (!%p45_p4)
}
  0x46   :  { %s49_s15 = scalar_lea.hbm %s88_s1, 16 }
  0x47   :  { %p50_p5 = scmp.ne.s32.totalorder %s88_s1, %s49_s15  ;;  %p53_p6 = scmp.lt.u32.totalorder %s49_s15, %s88_s1 }
  0x49   :  { %p55_p7 = pnand %p53_p6, %p50_p5 }
  0x4b   :  { %58 = shalt.err (!%p55_p7)
}
  0x4c   :  { %27 = dma.vmem_to_hbm [thread:$0]  %s25_s10, 16, %s88_s1, [#allocation4]  }
  0x4d   :  { %59 = dma.done.wait [#allocation4], 16  }
  0x4e   :  { %60 = vsyncadd [#allocation4], 4294967280 }
  0x4f   :  { %31 = vsyncpa [#allocation4], 1 }

</bundles_post_ra>
